<compile_context>
chip_gen: v7x
topology: tpu7x:2x2x1
jax: 0.10.0
libtpu: 0.0.40
codegen_flags: <defaults>
</compile_context>

<pallas_src>
import jax
import jax.numpy as jnp
from jax.experimental import pallas as pl
from jax.experimental.pallas import tpu as pltpu


def _gcn_fused_kernel(x_ref, w_ref, b_ref, o_ref):
    # x_ref : (tb, N*Fin)        lane-dense input block (bf16 or f32)
    # w_ref : (N*Fin, N*Fout)    fused operator  I (x) Ws^T + norm_adj^T (x) Wn^T
    # b_ref : (1, N*Fout)        fused bias, f32
    # o_ref : (tb, N*Fout)       lane-dense output block
    acc = jnp.dot(x_ref[...], w_ref[...], preferred_element_type=jnp.float32)
    o_ref[...] = jnp.maximum(acc + b_ref[...], 0.0).astype(o_ref.dtype)


def _round_up(v, m):
    return -(-v // m) * m


def gcn_layer(x, adj, n_agents, w_self, b_self, w_neigh, b_neigh, *,
              tb=None, compute_dtype=jnp.bfloat16):
    """x: [B, N, Fin], adj: [N, N] -> [B, N, Fout] (matches the PyTorch forward)."""
    B, N, Fin = x.shape
    Fout = w_self.shape[0]
    assert adj.shape == (N, N)
    assert n_agents == N

    K, Nout = N * Fin, N * Fout
    out_dtype = x.dtype

    # ---- fold adjacency + both linear layers into ONE operator (hoisted) ----
    norm_adj = adj.astype(jnp.float32) * (1.0 / float(n_agents))       # (N, N)
    ws_t = w_self.astype(jnp.float32).T                                # (Fin, Fout)
    wn_t = w_neigh.astype(jnp.float32).T                               # (Fin, Fout)
    eye = jnp.eye(N, dtype=jnp.float32)
    # W_big[(m*Fin+i),(n*Fout+f)] = delta(m,n)*Ws^T[i,f] + norm_adj[n,m]*Wn^T[i,f]
    w_big = jnp.kron(eye, ws_t) + jnp.kron(norm_adj.T, wn_t)           # (K, Nout)
    # b_big[n*Fout+f] = b_self[f] + rowsum(norm_adj)[n] * b_neigh[f]
    b_big = (b_self.astype(jnp.float32)[None, :] +
             norm_adj.sum(axis=1)[:, None] * b_neigh.astype(jnp.float32)[None, :])
    b_big = b_big.reshape(1, Nout)

    w_big = w_big.astype(compute_dtype)
    x2 = x.reshape(B, K).astype(compute_dtype)     # contiguous reshape (no copy)

    # ---- batch tiling -------------------------------------------------------
    in_itemsize = jnp.dtype(compute_dtype).itemsize
    out_itemsize = jnp.dtype(out_dtype).itemsize

    if tb is None:
        target = max(8, (1 << 20) // max(1, K * in_itemsize))   # ~1 MiB x block
        if B > target:
            tb = max(8, (target // 8) * 8)
        elif B >= 16:
            # keep >=2 grid steps so v7x's two TensorCores both get work
            tb = _round_up(pl.cdiv(B, 2), 8)
        else:
            tb = B
    tb = max(1, min(int(tb), B))
    # multi-block grids need an 8-row (sublane) aligned block
    if tb < B and tb % 8 != 0:
        tb = min(_round_up(tb, 8), B)

    # cap resident VMEM (double-buffered blocks + invariants) under ~40 MiB (v7x: 64 MiB/TC)
    def _resident(t):
        return (2 * t * (K * in_itemsize + Nout * out_itemsize)
                + 2 * K * Nout * in_itemsize + 2 * Nout * 4)
    while tb > 8 and _resident(tb) > (40 << 20):
        tb = max(8, ((tb // 2) // 8) * 8)

    # prefer a tb that divides B -> no jnp.pad (extra HBM pass over x)
    if B % tb != 0:
        for cand in range(tb, max(7, tb // 2), -1):
            if B % cand == 0 and cand % 8 == 0:
                tb = cand
                break

    n_blocks = pl.cdiv(B, tb)
    Bp = n_blocks * tb
    x_p = x2 if Bp == B else jnp.pad(x2, ((0, Bp - B), (0, 0)))

    vmem_limit = int(min(max(_resident(tb) + (2 << 20), 16 << 20), 48 << 20))

    out2 = pl.pallas_call(
        _gcn_fused_kernel,
        out_shape=jax.ShapeDtypeStruct((Bp, Nout), out_dtype),
        grid_spec=pltpu.PrefetchScalarGridSpec(
            num_scalar_prefetch=0,
            grid=(n_blocks,),
            in_specs=[
                pl.BlockSpec((tb, K), lambda b: (b, 0)),      # x block (lane-dense)
                pl.BlockSpec((K, Nout), lambda b: (0, 0)),    # fused operator
                pl.BlockSpec((1, Nout), lambda b: (0, 0)),    # fused bias
            ],
            out_specs=pl.BlockSpec((tb, Nout), lambda b: (b, 0)),
        ),
        compiler_params=pltpu.CompilerParams(
            dimension_semantics=("parallel",),
            vmem_limit_bytes=vmem_limit),
    )(x_p, w_big, b_big)

    out2 = out2 if Bp == B else out2[:B]
    return out2.reshape(B, N, Fout)


def gcn_layer_ref(x, adj, n_agents, w_self, b_self, w_neigh, b_neigh):
    """Pure-JAX reference matching the PyTorch forward (f32)."""
    self_loop = x @ w_self.T + b_self
    neigh_out = x @ w_neigh.T + b_neigh
    norm_adj = adj / n_agents
    aggregate = jnp.einsum("nm,bmf->bnf", norm_adj, neigh_out)
    return jax.nn.relu(self_loop + aggregate)


if __name__ == "__main__":
    key = jax.random.PRNGKey(0)
    k_x, k_adj, k_ws, k_bs, k_wn, k_bn = jax.random.split(key, 6)

    batch, n_agents, in_features, out_features = 48, 8, 32, 32

    x = jax.random.normal(k_x, (batch, n_agents, in_features), jnp.float32)
    adj = (jax.random.uniform(k_adj, (n_agents, n_agents)) > 0.5).astype(jnp.float32)

    # Deterministic params mirroring module __init__:
    # weight ~ N(0, 0.1); bias ~ U(-1/sqrt(in), 1/sqrt(in)) (PyTorch Linear default)
    w_self = 0.1 * jax.random.normal(k_ws, (out_features, in_features), jnp.float32)
    w_neigh = 0.1 * jax.random.normal(k_wn, (out_features, in_features), jnp.float32)
    bound = 1.0 / (in_features ** 0.5)
    b_self = jax.random.uniform(k_bs, (out_features,), jnp.float32, -bound, bound)
    b_neigh = jax.random.uniform(k_bn, (out_features,), jnp.float32, -bound, bound)

    ref = gcn_layer_ref(x, adj, n_agents, w_self, b_self, w_neigh, b_neigh)

    # 1) bf16 MXU path, explicit tb=16 (3 grid steps, no padding).
    out = jax.block_until_ready(
        gcn_layer(x, adj, n_agents, w_self, b_self, w_neigh, b_neigh, tb=16))
    assert out.shape == (batch, n_agents, out_features)
    assert jnp.allclose(out, ref, atol=3e-2, rtol=3e-2), "bf16 (tb=16) mismatch"

    # 2) bf16 MXU path, default tiling (>=2 grid steps for v7x dual TC).
    out2 = jax.block_until_ready(
        gcn_layer(x, adj, n_agents, w_self, b_self, w_neigh, b_neigh))
    assert jnp.allclose(out2, ref, atol=3e-2, rtol=3e-2), "bf16 (default tb) mismatch"

    # 3) f32 compute path (tight tolerance) on a ragged batch -> exercises padding.
    out3 = jax.block_until_ready(
        gcn_layer(x[:44], adj, n_agents, w_self, b_self, w_neigh, b_neigh,
                  tb=16, compute_dtype=jnp.float32))
    assert jnp.allclose(out3, ref[:44], atol=1e-5, rtol=1e-5), "f32 padded mismatch"

    print("KERNEL_OK")
</pallas_src>

<mosaic_0001>
module attributes {stable_mosaic.version = 11 : i64} {
  func.func @_gcn_fused_kernel(%arg0: i32, %arg1: memref<16x256xbf16, #tpu.memory_space<vmem>>, %arg2: memref<256x256xbf16, #tpu.memory_space<vmem>>, %arg3: memref<1x256xf32, #tpu.memory_space<vmem>>, %arg4: memref<16x256xf32, #tpu.memory_space<vmem>>) attributes {dimension_semantics = [#tpu.dimension_semantics<parallel>], iteration_bounds = array<i64: 3>, scalar_prefetch = 0 : i64, scratch_operands = 0 : i64, tpu.core_type = #tpu.core_type<tc>, window_params = [{transform_indices = @transform_0, window_bounds = array<i64: 16, 256>}, {pipeline_mode = #tpu.pipeline_mode<synchronous>, transform_indices = @transform_1, window_bounds = array<i64: 256, 256>}, {pipeline_mode = #tpu.pipeline_mode<synchronous>, transform_indices = @transform_2, window_bounds = array<i64: 1, 256>}, {transform_indices = @transform_3, window_bounds = array<i64: 16, 256>}]} {
    %c0 = arith.constant 0 : index
    %c0_0 = arith.constant 0 : index
    %0 = vector.load %arg1[%c0, %c0_0] : memref<16x256xbf16, #tpu.memory_space<vmem>>, vector<16x256xbf16>
    %c0_1 = arith.constant 0 : index
    %c0_2 = arith.constant 0 : index
    %1 = vector.load %arg2[%c0_1, %c0_2] : memref<256x256xbf16, #tpu.memory_space<vmem>>, vector<256x256xbf16>
    %cst = arith.constant dense<0.000000e+00> : vector<16x256xf32>
    %2 = tpu.matmul %0, %1, %cst {dimension_numbers = #tpu.dot_dimension_numbers<[1], [0], [0], [1], [0, 0, 1, 1], [], []>} : vector<16x256xbf16>, vector<256x256xbf16>, vector<16x256xf32> -> vector<16x256xf32>
    %c0_3 = arith.constant 0 : index
    %c0_4 = arith.constant 0 : index
    %3 = vector.load %arg3[%c0_3, %c0_4] : memref<1x256xf32, #tpu.memory_space<vmem>>, vector<1x256xf32>
    %4 = vector.broadcast %3 : vector<1x256xf32> to vector<16x256xf32>
    %5 = arith.addf %2, %4 : vector<16x256xf32>
    %cst_5 = arith.constant 0.000000e+00 : f32
    %6 = vector.broadcast %cst_5 : f32 to vector<16x256xf32>
    %7 = arith.maximumf %5, %6 : vector<16x256xf32>
    %c0_6 = arith.constant 0 : index
    %c0_7 = arith.constant 0 : index
    %8 = vector.load %arg4[%c0_6, %c0_7] : memref<16x256xf32, #tpu.memory_space<vmem>>, vector<16x256xf32>
    tpu.vector_store %arg4[%c0_6, %c0_7], %7 {strides = array<i32>} : memref<16x256xf32, #tpu.memory_space<vmem>>, vector<16x256xf32>,
    return
  }
  func.func @transform_0(%arg0: i32) -> (i32, i32) {
    %c0_i32 = arith.constant 0 : i32
    %c0_i32_0 = arith.constant 0 : i32
    return %arg0, %c0_i32 : i32, i32
  }
  func.func @transform_1(%arg0: i32) -> (i32, i32) {
    %c0_i32 = arith.constant 0 : i32
    %c0_i32_0 = arith.constant 0 : i32
    %c0_i32_1 = arith.constant 0 : i32
    return %c0_i32, %c0_i32_0 : i32, i32
  }
  func.func @transform_2(%arg0: i32) -> (i32, i32) {
    %c0_i32 = arith.constant 0 : i32
    %c0_i32_0 = arith.constant 0 : i32
    %c0_i32_1 = arith.constant 0 : i32
    return %c0_i32, %c0_i32_0 : i32, i32
  }
  func.func @transform_3(%arg0: i32) -> (i32, i32) {
    %c0_i32 = arith.constant 0 : i32
    %c0_i32_0 = arith.constant 0 : i32
    return %arg0, %c0_i32 : i32, i32
  }
}

</mosaic_0001>

<bundles_post_ra>
// kernel: tpu_custom_call.1
= control target key start
LH: loop header
LB: loop body
LE: loop exit
PB: predicated region body
PF: predicated region fallthrough
CT: control target
= control target key end

     0   :  { %8 = vsyncpa [#allocation3], 0  ;;  %s1103_s0 = inlined_call_operand.hbm [shape: bf16[48,256], index: 0, kind: input, shape index: {}]   ;;  %s1104_s1 = inlined_call_operand.hbm [shape: bf16[256,256], index: 1, kind: input, shape index: {}]   ;;  %s1105_s2 = inlined_call_operand.vmem [shape: f32[1,256], index: 2, kind: input, shape index: {}]   ;;  %s1106_s3 = inlined_call_operand.hbm [shape: f32[48,256], index: 3, kind: output, shape index: {}]  }
   0x1   :  { %10 = vsyncpa [#allocation3 + $0x1], 0 }
   0x2   :  { %11 = vsyncpa [#allocation6], 0 }
   0x3   :  { %12 = vsyncpa [#allocation4], 0 }
   0x4   :  { %14 = vsyncpa [#allocation4 + $0x1], 0  ;;  %s897_s12 = smov 0   ;;  %s899_s13 = smov 0  }
   0x5   :  { %s901_s14 = smov 0   ;;  %s903_s15 = smov 0  }
   0x6 LB: > { %s918_s16 = sadd.s32 4294967295, %s868_s15   ;;  %s572_s17 = sadd.s32 4294967294, %s868_s15   ;;  %s868_s15 = sphi %s903_s15, %s1125_s15   ;;  %s864_s14 = sphi %s901_s14, %s1124_s14   ;;  %s860_s13 = sphi %s899_s13, %s1123_s13   ;;  %s856_s12 = sphi %s897_s12, %s1122_s12  }
   0x7   : > { %p40_p0 = scmp.ne.s32.totalorder %s860_s13, %s856_s12  ;;  %p1107_p1 = scmp.eq.s32.totalorder %s918_s16, 0 }
   0x8   : > { %p112_p3 = scmp.eq.s32.totalorder %s572_s17, 2  ;;  %p573_p5 = scmp.ge.s32.totalorder %s868_s15, 1 }
   0x9   : > { %p927_p4 = por %p1107_p1, %p40_p0  ;;  %p119_p7 = scmp.lt.s32.totalorder %s868_s15, 4 }
   0xa   : > { %p932_p6 = por %p112_p3, %p40_p0  ;;  %s870_s21 = smov [#allocation5]  }
   0xb   : > { %s1110_s18 = scalar_select %p927_p4, 1, 0 }
   0xc   : > { %s1111_s19 = scalar_select %p932_p6, 1, 0 }
   0xd   : > { %p937_p8 = pnand %p573_p5, %p119_p7  ;;  %s131_s22 = sshll.u32 %s870_s21, 4  ;;  %s132_s22 = int_to_ptr.vmem [resolvable:$true] %s131_s22 }
   0xe   : > { %s950_s24 = sadd.s32 1, %s868_s15   ;;  %s27_s25 = sadd.s32 1, %s864_s14 }
   0xf   : > { %s1112_s20 = scalar_select %p937_p8, 1, 0 }
  0x10   : > { %p636_p9 = pneg %p937_p8  ;;  %s24_s26 = ssub.s32 %s868_s15, %s950_s24 }
  0x11   : > { %s740_s29 = scalar_lea.hbm %s1104_s1, 4096 }
  0x12   : > { %p945_p10 = pnand %p636_p9, %p1107_p1  ;;  %p741_p11 = scmp.ne.s32.totalorder %s1104_s1, %s740_s29 }
  0x13   : > { %p747_p3 = scmp.lt.u32.totalorder %s740_s29, %s1104_s1 }
  0x14   : > { %p742_p12 = pneg %p945_p10 }
  0x16   : > { %p743_p13 = pnand %p742_p12, %p741_p11 }
  0x18   : > { %p744_p0 = pneg %p743_p13 }
  0x1a   : > { %p749_p5 = pnand %p747_p3, %p744_p0 }
  0x1c   : > { %752 = shalt.err (!%p749_p5)
}
  0x1d   : > { %s753_s7 = scalar_lea.vmem %s132_s22, 4096  ;;  %p761_p2 = scmp.lt.s32.totalorder %s132_s22, %s132_s22 }
  0x1e   : > { %p754_p7 = scmp.ne.s32.totalorder %s132_s22, %s753_s7  ;;  %p762_p6 = scmp.lt.s32.totalorder %s753_s7, %s753_s7 }
  0x20   : > { %p756_p9 = pnand %p754_p7, %p742_p12  ;;  %p763_p4 = por %p762_p6, %p761_p2 }
  0x22   : > { %p757_p1 = pneg %p756_p9 }
  0x24   : > { %p764_p8 = pnand %p763_p4, %p757_p1 }
  0x26   : > { %767 = shalt.err (!%p764_p8)
}
  0x27   : > { %s871_s8 = smov 128   ;;  %s872_s9 = smov 8  }
  0x28   : > { %639 = dma.hbm_to_vmem [thread:$0]  (!%p945_p10), %s1104_s1, 4096, %s132_s22, [#allocation6], %s871_s8, %s871_s8, %s872_s9  }
  0x29   : > { %p25_p1 = scmp.eq.s32.totalorder %s24_s26, 0  ;;  %p34_p2 = scmp.ne.s32.totalorder %s864_s14, %s860_s13 }
  0x2a   : > { %p35_p4 = scmp.eq.s32.totalorder %s868_s15, 0  ;;  %p649_p6 = scmp.lt.s32.totalorder %s868_s15, 3 }
  0x2b   : > { %s979_s17 = scalar_select %p25_p1, %s864_s14, %s27_s25  }
  0x2c   : > { %p36_p8 = por %p35_p4, %p34_p2  ;;  %p1114_p11 = scmp.eq.s32.totalorder %s918_s16, 2 }
  0x2d   : > { %s148_s23 = sand.u32 1, %s864_s14   ;;  %s625_s27 = sshll.u32 %s868_s15, 8 }
  0x2e   : > { %p983_p12 = por %p1114_p11, %p34_p2  ;;  %s576_s28 = sshll.u32 %s148_s23, 4 }
  0x2f   : > { %s992_s4 = scalar_lea.hbm %s1103_s0, %s625_s27  ;;  %s152_s22 = scalar_lea.vmem [#allocation2], %s576_s28 }
  0x30   : > { %s160_s25 = sshll.u32 %s152_s22, 4  ;;  %p994_p10 = pnand %p649_p6, %p36_p8  ;;  %s998_s25 = int_to_ptr.vmem [resolvable:$true] %s160_s25 }
  0x31   : > { %s1000_s5 = scalar_lea.sflag [#allocation3], %s148_s23  ;;  %s768_s6 = scalar_lea.hbm %s992_s4, 256 }
  0x32   : > { %p769_p13 = scmp.ne.s32.totalorder %s992_s4, %s768_s6  ;;  %p770_p0 = pneg %p994_p10 }
  0x33   : > { %s773_s11 = scalar_lea.hbm %s1103_s0, 768  ;;  %p774_p7 = scmp.lt.u32.totalorder %s992_s4, %s1103_s0 }
  0x34   : > { %p771_p3 = pnand %p770_p0, %p769_p13  ;;  %p775_p9 = scmp.lt.u32.totalorder %s773_s11, %s768_s6 }
  0x35   : > { %p777_p2 = scmp.lt.u32.totalorder %s768_s6, %s992_s4 }
  0x36   : > { %p772_p5 = pneg %p771_p3  ;;  %p776_p1 = por %p775_p9, %p774_p7 }
  0x38   : > { %p778_p4 = por %p777_p2, %p776_p1 }
  0x3a   : > { %p779_p6 = pnand %p778_p4, %p772_p5 }
  0x3c   : > { %782 = shalt.err (!%p779_p6)
}
  0x3d   : > { %s783_s23 = scalar_lea.vmem %s998_s25, 256  ;;  %s873_s29 = smov [#allocation2]  }
  0x3e   : > { %p784_p8 = scmp.ne.s32.totalorder %s998_s25, %s783_s23  ;;  %s788_s30 = sshll.u32 %s873_s29, 4  ;;  %s789_s30 = int_to_ptr.vmem [resolvable:$false] %s788_s30 }
  0x3f   : > { %s790_s22 = scalar_lea.vmem %s789_s30, 512  ;;  %p791_p3 = scmp.lt.s32.totalorder %s998_s25, %s789_s30 }
  0x40   : > { %p786_p11 = pnand %p784_p8, %p770_p0  ;;  %p792_p7 = scmp.lt.s32.totalorder %s790_s22, %s783_s23 }
  0x42   : > { %p787_p13 = pneg %p786_p11  ;;  %p793_p9 = por %p792_p7, %p791_p3 }
  0x44   : > { %p794_p1 = pnand %p793_p9, %p787_p13 }
  0x46   : > { %797 = shalt.err (!%p794_p1)
}
  0x47   : > { %643 = dma.hbm_to_vmem [thread:$0]  (!%p994_p10), %s992_s4, 256, %s998_s25, %s1000_s5, %s871_s8, %s871_s8, %s872_s9  }
  0x48   : > { %p1117_p0 = scmp.ne.s32.totalorder %s1112_s20, 0 }
  0x49   : > { %s1034_s6 = sand.u32 (!%p1117_p0), 1, %s860_s13   ;;  %p1118_p5 = scmp.ne.s32.totalorder (!%p1117_p0), %s1110_s18, 0 }
  0x4a   : > { %172 = sbr.rel (%p1117_p0) target bundleno = 384 (0x180), region = 32  ;;  %s581_s7 = sshll.u32 (!%p1117_p0), %s1034_s6, 4 }
  0x4b   : > { %s175_s10 = scalar_lea.sflag (!%p1117_p0), [#allocation3], %s1034_s6  ;;  %s1038_s11 = scalar_lea.vmem (!%p1117_p0), [#allocation2], %s581_s7 }
  0x51   : > { %843 = dma.done.wait (%p1118_p5), %s175_s10, 256  }
  0x52   : > { %845 = vsyncadd (%p1118_p5), %s175_s10, 4294967040  ;;  %p1119_p10 = scmp.eq.s32.totalorder %s918_s16, 0 }
  0x54   : > { %847 = dma.done.wait (%p1119_p10), [#allocation6], 4096   ;;  %p1120_p2 = pmov %p1119_p10 }
  0x55   : > { %v689_v0 = vld [vmem:[#allocation5 + $0x4] ss:$8 sps:$4 sm:$0xff]   ;;  %v691_v1 = vld [vmem:[#allocation5] ss:$8 sps:$4 sm:$0xff]   ;;  %v692_v2 = vld [vmem:[#allocation5 + $0x14] ss:$8 sps:$4 sm:$0xff]   ;;  %v243_v34 = vlaneseq }
  0x56   : > { %849 = vsyncadd (%p1120_p2), [#allocation6], 4294963200  ;;  %423 = vmatprep.subr.bf16.mxu0 %v689_v0  ;;  %v694_v3 = vld [vmem:[#allocation5 + $0x10] ss:$8 sps:$4 sm:$0xff]   ;;  %v695_v4 = vld [vmem:[#allocation5 + $0x24] ss:$8 sps:$4 sm:$0xff]  }
  0x57   : > { %424 = vmatpush1.bf16.msra.mxu0 %v691_v1  ;;  %v697_v5 = vld [vmem:[#allocation5 + $0x20] ss:$8 sps:$4 sm:$0xff]   ;;  %v698_v6 = vld [vmem:[#allocation5 + $0x34] ss:$8 sps:$4 sm:$0xff]   ;;  %v700_v7 = vld [vmem:[#allocation5 + $0x30] ss:$8 sps:$4 sm:$0xff]  }
  0x58   : > { %425 = vmatprep.subr.bf16.mxu0 %v692_v2  ;;  %v701_v8 = vld [vmem:[#allocation5 + $0x44] ss:$8 sps:$4 sm:$0xff]   ;;  %v703_v9 = vld [vmem:[#allocation5 + $0x40] ss:$8 sps:$4 sm:$0xff]   ;;  %v704_v10 = vld [vmem:[#allocation5 + $0x54] ss:$8 sps:$4 sm:$0xff]  }
  0x59   : > { %v706_v11 = vld [vmem:[#allocation5 + $0x50] ss:$8 sps:$4 sm:$0xff]   ;;  %v707_v12 = vld [vmem:[#allocation5 + $0x64] ss:$8 sps:$4 sm:$0xff]   ;;  %v709_v14 = vld [vmem:[#allocation5 + $0x60] ss:$8 sps:$4 sm:$0xff]  }
  0x5a   : > { %v739_v13 = vld [vmem:[%s1038_s11 + $0x4] ss:$8 sps:$4 sm:$0xff]   ;;  %v712_v16 = vld [vmem:[#allocation5 + $0x70] ss:$8 sps:$4 sm:$0xff]   ;;  %v715_v18 = vld [vmem:[#allocation5 + $0x80] ss:$8 sps:$4 sm:$0xff]  }
  0x5b   : > { %426 = vmatpush1.bf16.msra.mxu0 %v694_v3  ;;  %v710_v15 = vld [vmem:[#allocation5 + $0x74] ss:$8 sps:$4 sm:$0xff]   ;;  %455 = vmatprep.mubr.bf16.mxu0 %v739_v13  ;;  %v713_v17 = vld [vmem:[#allocation5 + $0x84] ss:$8 sps:$4 sm:$0xff]   ;;  %v718_v20 = vld [vmem:[#allocation5 + $0x90] ss:$8 sps:$4 sm:$0xff]  }
  0x5c   : > { %427 = vmatprep.subr.bf16.mxu0 %v695_v4  ;;  %v716_v19 = vld [vmem:[#allocation5 + $0x94] ss:$8 sps:$4 sm:$0xff]   ;;  %v719_v21 = vld [vmem:[#allocation5 + $0xa4] ss:$8 sps:$4 sm:$0xff]   ;;  %v721_v22 = vld [vmem:[#allocation5 + $0xa0] ss:$8 sps:$4 sm:$0xff]  }
  0x5d   : > { %v722_v23 = vld [vmem:[#allocation5 + $0xb4] ss:$8 sps:$4 sm:$0xff]   ;;  %v724_v24 = vld [vmem:[#allocation5 + $0xb0] ss:$8 sps:$4 sm:$0xff]   ;;  %v725_v25 = vld [vmem:[#allocation5 + $0xc4] ss:$8 sps:$4 sm:$0xff]  }
  0x5e   : > { %v727_v26 = vld [vmem:[#allocation5 + $0xc0] ss:$8 sps:$4 sm:$0xff]   ;;  %v728_v27 = vld [vmem:[#allocation5 + $0xd4] ss:$8 sps:$4 sm:$0xff]   ;;  %v730_v28 = vld [vmem:[#allocation5 + $0xd0] ss:$8 sps:$4 sm:$0xff]  }
  0x5f   : > { %428 = vmatpush1.bf16.msra.mxu0 %v697_v5  ;;  %v731_v29 = vld [vmem:[#allocation5 + $0xe4] ss:$8 sps:$4 sm:$0xff]   ;;  %v733_v30 = vld [vmem:[#allocation5 + $0xe0] ss:$8 sps:$4 sm:$0xff]   ;;  %v734_v31 = vld [vmem:[#allocation5 + $0xf4] ss:$8 sps:$4 sm:$0xff]  }
  0x60   : > { %429 = vmatprep.subr.bf16.mxu0 %v698_v6  ;;  %v736_v32 = vld [vmem:[#allocation5 + $0xf0] ss:$8 sps:$4 sm:$0xff]   ;;  %v244_v35 = vshrl.u32 %v243_v34, 7  ;;  %v241_v37 = vld [vmem:[%s1105_s2] sm:$0x3]  ;;  %s583_s8 = sshll.u32 %s1034_s6, 5 }
  0x61   : > { %v737_v33 = vld [vmem:[%s1038_s11] ss:$8 sps:$4 sm:$0xff]   ;;  %s204_s9 = scalar_lea.vmem [#allocation7], %s583_s8  ;;  %s627_s25 = sshll.u32 %s918_s16, 9 }
  0x62   : > { %v245_v36 = vsub.s32 0, %v244_v35  ;;  %v249_v38 = vsub.s32 1, %v244_v35  ;;  %s489_s4 = sshll.u32 %s204_s9, 4  ;;  %s1060_s27 = scalar_lea.hbm %s1106_s3, %s627_s25  ;;  %s1055_s4 = int_to_ptr.vmem [resolvable:$true] %s489_s4 }
  0x63   : > { %430 = vmatpush1.bf16.msra.mxu0 %v700_v7  ;;  %s475_s16 = scalar_lea.sflag [#allocation4], %s1034_s6  ;;  %s798_s28 = scalar_lea.vmem %s1055_s4, 512 }
  0x64   : > { %431 = vmatprep.subr.bf16.mxu0 %v701_v8  ;;  %v246_v39 = vrot.slane %v241_v37, %v245_v36  ;;  %v250_v40 = vrot.slane %v241_v37, %v249_v38  ;;  %p799_p4 = scmp.ne.s32.totalorder %s1055_s4, %s798_s28  ;;  %s874_s23 = smov [#allocation7]  }
  0x65   : > { %s802_s29 = sshll.u32 %s874_s23, 4  ;;  %s803_s29 = int_to_ptr.vmem [resolvable:$false] %s802_s29 }
  0x66   : > { %p800_p6 = pnand %p799_p4, %p983_p12  ;;  %s804_s30 = scalar_lea.vmem %s803_s29, 1024 }
  0x67   : > { %432 = vmatpush1.bf16.msra.mxu0 %v703_v9  ;;  %p805_p11 = scmp.lt.s32.totalorder %s1055_s4, %s803_s29  ;;  %p806_p13 = scmp.lt.s32.totalorder %s804_s30, %s798_s28 }
  0x68   : > { %433 = vmatprep.subr.bf16.mxu0 %v704_v10  ;;  %p801_p8 = pneg %p800_p6 }
  0x69   : > { %p807_p3 = por %p806_p13, %p805_p11 }
  0x6b   : > { %434 = vmatpush1.bf16.msra.mxu0 %v706_v11  ;;  %p808_p7 = pnand %p807_p3, %p801_p8 }
  0x6c   : > { %435 = vmatprep.subr.bf16.mxu0 %v707_v12 }
  0x6f   : > { %436 = vmatpush1.bf16.msra.mxu0 %v709_v14 }
  0x70   : > { %437 = vmatprep.subr.bf16.mxu0 %v710_v15 }
  0x73   : > { %438 = vmatpush1.bf16.msra.mxu0 %v712_v16 }
  0x74   : > { %439 = vmatprep.subr.bf16.mxu0 %v713_v17 }
  0x77   : > { %440 = vmatpush1.bf16.msra.mxu0 %v715_v18 }
  0x78   : > { %441 = vmatprep.subr.bf16.mxu0 %v716_v19 }
  0x7b   : > { %442 = vmatpush1.bf16.msra.mxu0 %v718_v20 }
  0x7c   : > { %443 = vmatprep.subr.bf16.mxu0 %v719_v21 }
  0x7f   : > { %444 = vmatpush1.bf16.msra.mxu0 %v721_v22 }
  0x80   : > { %445 = vmatprep.subr.bf16.mxu0 %v722_v23 }
  0x83   : > { %446 = vmatpush1.bf16.msra.mxu0 %v724_v24 }
  0x84   : > { %447 = vmatprep.subr.bf16.mxu0 %v725_v25 }
  0x87   : > { %448 = vmatpush1.bf16.msra.mxu0 %v727_v26 }
  0x88   : > { %449 = vmatprep.subr.bf16.mxu0 %v728_v27 }
  0x8b   : > { %450 = vmatpush1.bf16.msra.mxu0 %v730_v28 }
  0x8c   : > { %451 = vmatprep.subr.bf16.mxu0 %v731_v29 }
  0x8f   : > { %452 = vmatpush1.bf16.msra.mxu0 %v733_v30 }
  0x90   : > { %453 = vmatprep.subr.bf16.mxu0 %v734_v31 }
  0x93   : > { %454 = vmatpush1.bf16.msra.mxu0 %v736_v32 }
  0x96   : > { %456 = vmatmul.mubr.bf16.vlgmr.msra.gmra.mrb[0].mxu0 %v737_v33 }
 0x169   : > { %v457_v41 = vpop.f32.mrb[0].mxu0 }
 0x16a   : > { %v458_v42 = vadd.f32 %v457_v41, %v246_v39  ;;  %v459_v43 = vpop.f32.mrb[1].mxu0 }
 0x16b   : > { %v460_v44 = vadd.f32 %v459_v43, %v250_v40  ;;  %v461_v45 = vpop.f32.mrb[2].mxu0 }
 0x16c   : > { %v466_v46 = vmax.f32 %v458_v42, 0.0  ;;  %v462_v47 = vadd.f32 %v461_v45, %v246_v39  ;;  %v463_v48 = vpop.f32.mrb[3].mxu0 }
 0x16d   : > { %v467_v49 = vmax.f32 %v460_v44, 0.0  ;;  %v464_v50 = vadd.f32 %v463_v48, %v250_v40 }
 0x16e   : > { %470 = vst [vmem:[%s204_s9] sm:$0xff] %v466_v46  ;;  %v468_v51 = vmax.f32 %v462_v47, 0.0 }
 0x16f   : > { %471 = vst [vmem:[%s204_s9 + $0x8] sm:$0xff] %v467_v49  ;;  %v469_v52 = vmax.f32 %v464_v50, 0.0 }
 0x170   : > { %472 = vst [vmem:[%s204_s9 + $0x10] sm:$0xff] %v468_v51 }
 0x171   : > { %473 = vst [vmem:[%s204_s9 + $0x18] sm:$0xff] %v469_v52 }
 0x172   : > { %811 = shalt.err (!%p808_p7)
}
 0x173   : > { %s812_s22 = scalar_lea.hbm %s1060_s27, 512  ;;  %s816_s11 = scalar_lea.hbm %s1106_s3, 1536 }
 0x174   : > { %p813_p9 = scmp.ne.s32.totalorder %s1060_s27, %s812_s22  ;;  %p817_p5 = scmp.lt.u32.totalorder %s1060_s27, %s1106_s3 }
 0x175   : > { %p818_p10 = scmp.lt.u32.totalorder %s816_s11, %s812_s22  ;;  %p820_p4 = scmp.lt.u32.totalorder %s812_s22, %s1060_s27 }
 0x176   : > { %p814_p1 = pnand %p813_p9, %p983_p12 }
 0x177   : > { %p819_p2 = por %p818_p10, %p817_p5 }
 0x178   : > { %p815_p0 = pneg %p814_p1 }
 0x179   : > { %p821_p6 = por %p820_p4, %p819_p2 }
 0x17b   : > { %p822_p8 = pnand %p821_p6, %p815_p0 }
 0x17d   : > { %825 = shalt.err (!%p822_p8)
}
 0x17e   : > { %s875_s8 = smov 256   ;;  %s876_s9 = smov 16  }
 0x17f   : > { %634 = dma.vmem_to_hbm [thread:$0]  (%p983_p12), %s1055_s4, 512, %s1060_s27, %s475_s16, %s875_s8, %s875_s8, %s876_s9  }
 0x180 PF: > { %p651_p11 = scmp.ge.s32.totalorder %s868_s15, 2  ;;  %s504_s25 = sand.u32 1, %s856_s12  }
 0x181   : > { %p1121_p13 = scmp.ne.s32.totalorder %s1111_s19, 0  ;;  %s505_s26 = scalar_lea.sflag [#allocation4], %s504_s25 }
 0x183   : > { %p645_p3 = pnand %p651_p11, %p1121_p13 }
 0x185   : > { %851 = dma.done.wait (!%p645_p3), %s505_s26, 512  }
 0x186   : > { %853 = vsyncadd (!%p645_p3), %s505_s26, 4294966784  ;;  %p17_p7 = scmp.ge.s32.totalorder %s950_s24, 5   ;;  %s1122_s12 = smov %s860_s13 }
 0x187   : > { %s1123_s13 = smov %s864_s14  ;;  %s1124_s14 = smov %s979_s17 }
 0x188   : > { %s1125_s15 = smov %s950_s24  ;;  %19 = sbr.rel (!%p17_p7) target bundleno = 6 (0x6), region = 81 }
 0x18f   :  { %510 = vsyncpa [#allocation3], 1 }
 0x190   :  { %512 = vsyncpa [#allocation3 + $0x1], 1 }
 0x191   :  { %513 = vsyncpa [#allocation6], 1 }
 0x192   :  { %514 = vsyncpa [#allocation4], 1 }
 0x193   :  { %516 = vsyncpa [#allocation4 + $0x1], 1 }

</bundles_post_ra>
